<compile_context>
chip_gen: v5e
topology: v5e:2x2
jax: 0.10.0
libtpu: 0.0.40
codegen_flags: <defaults>
</compile_context>

<pallas_src>
import functools

import jax
import jax.numpy as jnp
from jax import lax
from jax.experimental import pallas as pl
from jax.experimental.pallas import tpu as pltpu


def hc_critic_kernel(x_ref, w1_ref, w2_ref, aux_ref, o_ref):
    """Transposed-activation critic MLP.

    x_ref  : (TB, input_dim)   - natural HBM layout of the state batch tile
    w1_ref : (fc, input_dim)   - PyTorch nn.Linear (out, in) layout
    w2_ref : (fc, fc)
    aux_ref: (fc, 4)           - columns: [b1 | b2 | w3 (as a column) | b3 @ row 0]
    o_ref  : (1, TB)           - lane-dense value row
    """
    x = x_ref[...]
    aux = aux_ref[...]
    b1 = aux[:, 0:1]        # (fc, 1)
    b2 = aux[:, 1:2]        # (fc, 1)
    w3 = aux[:, 2:3]        # (fc, 1)
    b3 = aux[0:1, 3:4]      # (1, 1)

    # Layer 1: h = relu(W1 @ x^T + b1), as an NT contraction over input_dim so the
    # batch dim lands on lanes (MXU; same orientation as q @ k^T).
    h = lax.dot_general(
        w1_ref[...], x,
        dimension_numbers=(((1,), (1,)), ((), ())),
        preferred_element_type=jnp.float32)                       # (fc, TB)
    h = jnp.maximum(h + b1, 0.0)

    # Layer 2: standard matmul, batch stays on lanes.
    h = jnp.dot(w2_ref[...], h, preferred_element_type=jnp.float32)  # (fc, TB)
    h = jnp.maximum(h + b2, 0.0)

    # Layer 3 (fc -> 1): VPU multiply + XLU sublane reduce instead of an N=1 MXU
    # matmul; the result is already the lane-dense (1, TB) value row.
    v = jnp.sum(h * w3, axis=0, keepdims=True) + b3                # (1, TB)
    o_ref[...] = v.astype(o_ref.dtype)


def init_hc_critic_params(key, input_dim, fc_dim):
    """nn.Linear-style init.  Weights in PyTorch (out, in) layout; b1/b2/w3/b3
    packed column-wise into one (fc_dim, 4) slab."""
    ks = jax.random.split(key, 6)

    def uni(k, shape, fan_in):
        bound = 1.0 / jnp.sqrt(jnp.float32(fan_in))
        return jax.random.uniform(k, shape, jnp.float32, -bound, bound)

    w1 = uni(ks[0], (fc_dim, input_dim), input_dim)   # (out, in)
    b1 = uni(ks[1], (fc_dim,), input_dim)
    w2 = uni(ks[2], (fc_dim, fc_dim), fc_dim)
    b2 = uni(ks[3], (fc_dim,), fc_dim)
    w3 = uni(ks[4], (fc_dim,), fc_dim)                # PyTorch (1, fc) flattened
    b3 = uni(ks[5], (1,), fc_dim)

    aux = jnp.zeros((fc_dim, 4), jnp.float32)
    aux = aux.at[:, 0].set(b1).at[:, 1].set(b2).at[:, 2].set(w3).at[0, 3].set(b3[0])
    return (w1, w2, aux)


def _pick_batch_tile(requested, input_dim, fc_dim, vmem_budget_bytes=8 << 20):
    """Cap the batch tile so double-buffered x + intermediates + output stay well
    inside the default scoped VMEM of every TPU generation (v5e 16 MiB is the
    smallest; v7x has 64 MiB physical / 32 MiB default scoped)."""
    per_row = 4 * (2 * input_dim + 2 * fc_dim + 2)   # f32 bytes per batch row
    cap = vmem_budget_bytes // max(per_row, 1)
    tb = min(int(requested), int(cap))
    tb = max(256, (tb // 256) * 256)                  # multiple of 256: lane-dense
    return tb                                         # output blocks, 8-aligned x rows


@functools.partial(jax.jit, static_argnames=("batch_tile",))
def hc_critic_forward(state, params, batch_tile=2048):
    """HC_Critic.forward: returns (value, {}) with value of shape (B, 1)."""
    w1, w2, aux = params
    B, input_dim = state.shape
    fc_dim = w1.shape[0]

    flops = 2 * B * (input_dim * fc_dim + fc_dim * fc_dim + fc_dim)
    bytes_accessed = 4 * (B * input_dim + w1.size + w2.size + aux.size + B)
    cost = pl.CostEstimate(flops=flops, transcendentals=0,
                           bytes_accessed=bytes_accessed)

    out_shape = jax.ShapeDtypeStruct((1, B), jnp.float32)
    vmem = pltpu.MemorySpace.VMEM

    if B <= batch_tile:
        # Grid-less call: whole problem VMEM-resident, no pipeline overhead.
        row = pl.pallas_call(
            hc_critic_kernel,
            out_shape=out_shape,
            in_specs=[pl.BlockSpec(memory_space=vmem)] * 4,
            out_specs=pl.BlockSpec(memory_space=vmem),
            cost_estimate=cost,
        )(state, w1, w2, aux)
    else:
        # Batch-tiled call: weights/biases stay VMEM-resident across steps; the
        # batch axis is "parallel" (shards across both TensorCores on v7x).
        tb = _pick_batch_tile(batch_tile, input_dim, fc_dim)
        row = pl.pallas_call(
            hc_critic_kernel,
            out_shape=out_shape,
            grid=(pl.cdiv(B, tb),),
            in_specs=[
                pl.BlockSpec((tb, input_dim), lambda i: (i, 0)),
                pl.BlockSpec(w1.shape, lambda i: (0, 0)),
                pl.BlockSpec(w2.shape, lambda i: (0, 0)),
                pl.BlockSpec(aux.shape, lambda i: (0, 0)),
            ],
            out_specs=pl.BlockSpec((1, tb), lambda i: (0, i)),
            compiler_params=pltpu.CompilerParams(
                dimension_semantics=("parallel",)),
            cost_estimate=cost,
        )(state, w1, w2, aux)

    # (1, B) -> (B, 1): free layout plumbing in the wrapper.
    return row.reshape(B, 1), {}


def _reference(state, params):
    """Pure-JAX reference of HC_Critic.forward (full f32 precision)."""
    w1, w2, aux = params
    b1, b2, w3, b3 = aux[:, 0], aux[:, 1], aux[:, 2], aux[0, 3]
    dot = lambda a, b: jnp.dot(a, b, precision=lax.Precision.HIGHEST)
    h = jnp.maximum(dot(state, w1.T) + b1, 0.0)
    h = jnp.maximum(dot(h, w2.T) + b2, 0.0)
    return dot(h, w3[:, None]) + b3


if __name__ == "__main__":
    input_dim, fc_dim = 32, 32

    key = jax.random.PRNGKey(0)
    kx, kp, kx2 = jax.random.split(key, 3)
    params = init_hc_critic_params(kp, input_dim, fc_dim)

    # Small batch -> grid-less path (whole problem in VMEM).
    state = jax.random.normal(kx, (8, input_dim), jnp.float32)
    value, info = hc_critic_forward(state, params)
    jax.block_until_ready(value)
    assert value.shape == (8, 1)
    assert isinstance(info, dict) and len(info) == 0
    assert jnp.allclose(value, _reference(state, params), rtol=1e-4, atol=2e-4)

    # Larger, ragged batch -> batch-tiled "parallel" path with a partial last block.
    big_state = jax.random.normal(kx2, (3000, input_dim), jnp.float32)
    big_value, _ = hc_critic_forward(big_state, params)
    jax.block_until_ready(big_value)
    assert big_value.shape == (3000, 1)
    assert jnp.allclose(big_value, _reference(big_state, params),
                        rtol=1e-4, atol=2e-4)

    print("KERNEL_OK")
</pallas_src>

<mosaic_0001>
module attributes {stable_mosaic.version = 11 : i64} {
  func.func @hc_critic_kernel(%arg0: memref<8x32xf32, #tpu.memory_space<vmem>>, %arg1: memref<32x32xf32, #tpu.memory_space<vmem>>, %arg2: memref<32x32xf32, #tpu.memory_space<vmem>>, %arg3: memref<32x4xf32, #tpu.memory_space<vmem>>, %arg4: memref<1x8xf32, #tpu.memory_space<vmem>>) attributes {dimension_semantics = [], scalar_prefetch = 0 : i64, scratch_operands = 0 : i64, tpu.core_type = #tpu.core_type<tc>} {
    %c0 = arith.constant 0 : index
    %c0_0 = arith.constant 0 : index
    %0 = vector.load %arg0[%c0, %c0_0] : memref<8x32xf32, #tpu.memory_space<vmem>>, vector<8x32xf32>
    %c0_1 = arith.constant 0 : index
    %c0_2 = arith.constant 0 : index
    %1 = vector.load %arg3[%c0_1, %c0_2] : memref<32x4xf32, #tpu.memory_space<vmem>>, vector<32x4xf32>
    %2 = vector.extract_strided_slice %1 {offsets = [0, 0], sizes = [32, 1], strides = [1, 1]} : vector<32x4xf32> to vector<32x1xf32>
    %3 = vector.extract_strided_slice %1 {offsets = [0, 1], sizes = [32, 1], strides = [1, 1]} : vector<32x4xf32> to vector<32x1xf32>
    %4 = vector.extract_strided_slice %1 {offsets = [0, 2], sizes = [32, 1], strides = [1, 1]} : vector<32x4xf32> to vector<32x1xf32>
    %5 = vector.extract_strided_slice %1 {offsets = [0, 3], sizes = [1, 1], strides = [1, 1]} : vector<32x4xf32> to vector<1x1xf32>
    %c0_3 = arith.constant 0 : index
    %c0_4 = arith.constant 0 : index
    %6 = vector.load %arg1[%c0_3, %c0_4] : memref<32x32xf32, #tpu.memory_space<vmem>>, vector<32x32xf32>
    %cst = arith.constant dense<0.000000e+00> : vector<32x8xf32>
    %7 = tpu.matmul %6, %0, %cst {dimension_numbers = #tpu.dot_dimension_numbers<[1], [1], [0], [0], [0, 0, 1, 0], [], []>} : vector<32x32xf32>, vector<8x32xf32>, vector<32x8xf32> -> vector<32x8xf32>
    %8 = vector.broadcast %2 : vector<32x1xf32> to vector<32x8xf32>
    %9 = arith.addf %7, %8 : vector<32x8xf32>
    %cst_5 = arith.constant 0.000000e+00 : f32
    %10 = vector.broadcast %cst_5 : f32 to vector<32x8xf32>
    %11 = arith.maximumf %9, %10 : vector<32x8xf32>
    %c0_6 = arith.constant 0 : index
    %c0_7 = arith.constant 0 : index
    %12 = vector.load %arg2[%c0_6, %c0_7] : memref<32x32xf32, #tpu.memory_space<vmem>>, vector<32x32xf32>
    %cst_8 = arith.constant dense<0.000000e+00> : vector<32x8xf32>
    %13 = tpu.matmul %12, %11, %cst_8 {dimension_numbers = #tpu.dot_dimension_numbers<[1], [0], [0], [1], [0, 0, 1, 1], [], []>} : vector<32x32xf32>, vector<32x8xf32>, vector<32x8xf32> -> vector<32x8xf32>
    %14 = vector.broadcast %3 : vector<32x1xf32> to vector<32x8xf32>
    %15 = arith.addf %13, %14 : vector<32x8xf32>
    %cst_9 = arith.constant 0.000000e+00 : f32
    %16 = vector.broadcast %cst_9 : f32 to vector<32x8xf32>
    %17 = arith.maximumf %15, %16 : vector<32x8xf32>
    %18 = vector.broadcast %4 : vector<32x1xf32> to vector<32x8xf32>
    %19 = arith.mulf %17, %18 : vector<32x8xf32>
    %cst_10 = arith.constant dense<0.000000e+00> : vector<8xf32>
    %20 = vector.multi_reduction <add>, %19, %cst_10 [0] : vector<32x8xf32> to vector<8xf32>
    %21 = vector.shape_cast %20 : vector<8xf32> to vector<1x8xf32>
    %22 = vector.broadcast %5 : vector<1x1xf32> to vector<1x8xf32>
    %23 = arith.addf %21, %22 : vector<1x8xf32>
    %c0_11 = arith.constant 0 : index
    %c0_12 = arith.constant 0 : index
    %24 = vector.load %arg4[%c0_11, %c0_12] : memref<1x8xf32, #tpu.memory_space<vmem>>, vector<1x8xf32>
    tpu.vector_store %arg4[%c0_11, %c0_12], %23 {strides = array<i32>} : memref<1x8xf32, #tpu.memory_space<vmem>>, vector<1x8xf32>,
    return
  }
}

</mosaic_0001>

<bundles_post_ra>
// kernel: hc_critic_forward.1
= control target key start
LH: loop header
LB: loop body
LE: loop exit
PB: predicated region body
PF: predicated region fallthrough
CT: control target
= control target key end

     0   :  { %9 = vsyncpa [#allocation3], 0  ;;  %s438_s0 = inlined_call_operand.hbm [shape: f32[8,32], index: 0, kind: input, shape index: {}]   ;;  %s439_s1 = inlined_call_operand.vmem [shape: f32[32,32], index: 1, kind: input, shape index: {}]   ;;  %s440_s2 = inlined_call_operand.hbm [shape: f32[32,32], index: 2, kind: input, shape index: {}]   ;;  %s441_s3 = inlined_call_operand.vmem [shape: f32[32,4], index: 3, kind: input, shape index: {}]   ;;  %s442_s4 = inlined_call_operand.hbm [shape: f32[1,8], index: 4, kind: output, shape index: {}]  }
   0x1   :  { %10 = vsyncpa [#allocation6], 0 }
   0x2   :  { %11 = vsyncpa [#allocation4], 0  ;;  %s17_s17 = sshll.u32 %s438_s0, 4  ;;  %s361_s18 = smov [#allocation2]   ;;  %s18_s17 = int_to_ptr.hbm [resolvable:$true] %s17_s17 }
   0x3   :  { %s19_s19 = sshll.u32 %s361_s18, 4  ;;  %s29_s22 = sshll.u32 %s440_s2, 4  ;;  %s20_s19 = int_to_ptr.vmem [resolvable:$true] %s19_s19  ;;  %s30_s22 = int_to_ptr.hbm [resolvable:$true] %s29_s22 }
   0x4   :  { %22 = dma.hbm_to_vmem [thread:$0]  %s18_s17, 128, %s20_s19, [#allocation3]  }
   0x5   :  { %s362_s23 = smov [#allocation5]   ;;  %s363_s25 = smov 128  }
   0x6   :  { %s31_s24 = sshll.u32 %s362_s23, 4  ;;  %s364_s26 = smov 8   ;;  %s32_s24 = int_to_ptr.vmem [resolvable:$true] %s31_s24 }
   0x7   :  { %37 = dma.hbm_to_vmem [thread:$0]  %s30_s22, 512, %s32_s24, [#allocation6], %s363_s25, %s363_s25, %s364_s26  }
   0x8   :  { %355 = dma.done.wait [#allocation3], 128  }
   0x9   :  { %356 = vsyncadd [#allocation3], 4294967168 }
   0xa   :  { %357 = dma.done.wait [#allocation6], 512  }
   0xb   :  { %358 = vsyncadd [#allocation6], 4294966784  ;;  %v365_v0 = vmov 0   ;;  %vm77_vm0 = vcmask 261120   ;;  %v48_v1 = vld [vmem:[#allocation2] sm:$0xff]  ;;  %v54_v2 = vld [vmem:[%s439_s1 + $0x8] sm:$0xff] }
   0xc   :  { %274 = vset.pattern.permute.xlu1 %v365_v0  ;;  %273 = vset.pattern.permute.xlu0 %v365_v0  ;;  %v52_v3 = vld [vmem:[%s441_s3 + $0x18] sm:$0xff]  ;;  %v50_v4 = vld [vmem:[%s441_s3 + $0x8] sm:$0xff]  ;;  %v53_v5 = vld [vmem:[%s439_s1] sm:$0xff]  ;;  %v366_v12 = vmov 1   ;;  %v367_v16 = vmov 2   ;;  %v368_v27 = vmov 3  }
   0xd   :  { %259 = vmatpush.xpose.msk.msra.mxu3 %vm77_vm0, %v48_v1  ;;  %250 = vmatpush.xpose.msk.msra.mxu0 %vm77_vm0, %v48_v1  ;;  %v51_v6 = vld [vmem:[%s441_s3 + $0x10] sm:$0xff]  ;;  %v49_v7 = vld [vmem:[%s441_s3] sm:$0xff]  ;;  %v56_v9 = vld [vmem:[%s439_s1 + $0x18] sm:$0xff]  ;;  %vm211_vm1 = vcmask 64512   ;;  %s239_s17 = sshll.u32 %s442_s4, 4  ;;  %vm230_vm2 = vcmask 57344   ;;  %s240_s17 = int_to_ptr.hbm [resolvable:$true] %s239_s17 }
   0xe   :  { %74 = vperm.xlu0 %273, %v52_v3   ;;  %64 = vperm.xlu1 %274, %v50_v4   ;;  %v55_v8 = vld [vmem:[%s439_s1 + $0x10] sm:$0xff]  ;;  %v126_v29 = vld [vmem:[#allocation5] sm:$0xff]  ;;  %v128_v30 = vld [vmem:[#allocation5 + $0x10] sm:$0xff]  ;;  %s369_s1 = smov [#allocation7]  }
   0xf   :  { %275 = vset.pattern.permute.xlu2 %v366_v12  ;;  %v127_v31 = vld [vmem:[#allocation5 + $0x8] sm:$0xff]  ;;  %v129_v32 = vld [vmem:[#allocation5 + $0x18] sm:$0xff]  ;;  %s237_s3 = sshll.u32 %s369_s1, 4  ;;  %s238_s3 = int_to_ptr.vmem [resolvable:$true] %s237_s3 }
  0x10   :  { %252 = vmatmul.msk.f32.vlgmr.msra.gmra.mxu3 %vm77_vm0, %v54_v2  ;;  %251 = vmatmul.msk.f32.vlgmr.msra.gmra.mxu0 %vm77_vm0, %v53_v5 }
  0x11   :  { %131 = vperm.xlu2 %275, %v49_v7  }
  0x16   :  { %69 = vperm.xlu0 %273, %v51_v6   ;;  %59 = vperm.xlu1 %274, %v49_v7  }
  0x18   :  { %253 = vmatmul.msk.f32.gmra.mxu3 %vm77_vm0, %v55_v8 }
  0x19   :  { %135 = vperm.xlu2 %275, %v50_v4  }
  0x1e   :  { %277 = vset.pattern.permute.xlu1 %v366_v12  ;;  %276 = vset.pattern.permute.xlu0 %v366_v12 }
  0x1f   :  { %143 = vperm.xlu1 %277, %v52_v3   ;;  %139 = vperm.xlu0 %276, %v51_v6  }
  0x20   :  { %254 = vmatmul.msk.f32.gmra.mxu3 %vm77_vm0, %v56_v9 }
  0x21   :  { %278 = vset.pattern.permute.xlu2 %v367_v16 }
  0x22   :  { %192 = vperm.xlu2 %278, %v49_v7  }
  0x27   :  { %279 = vset.pattern.permute.xlu1 %v367_v16  ;;  %280 = vset.pattern.permute.xlu0 %v367_v16 }
  0x28   :  { %196 = vperm.xlu1 %279, %v50_v4   ;;  %204 = vperm.xlu0 %280, %v52_v3  }
  0x2a   :  { %200 = vperm.xlu2 %278, %v51_v6  }
  0x30   :  { %281 = vset.pattern.permute.xlu1 %v368_v27  ;;  %282 = vset.pattern.permute.xlu0 %v368_v27 }
  0x31   :  { %226 = vperm.xlu1 %281, %v49_v7  }
  0x6b   :  { %v132_v33 = vpop.permute.xlu2 %131 }
  0x73   :  { %v136_v34 = vpop.permute.xlu2 %135 }
  0x7c   :  { %v193_v38 = vpop.permute.xlu2 %192 }
  0x80   :  { %v75_v11 = vpop.permute.xlu0 %74  ;;  %v65_v14 = vpop.permute.xlu1 %64 }
  0x84   :  { %v201_v50 = vpop.permute.xlu2 %200 }
  0x88   :  { %v70_v15 = vpop.permute.xlu0 %69  ;;  %v60_v20 = vpop.permute.xlu1 %59 }
  0x8d   :  { %v110_v21 = vpop.f32.mrf.mxu0 }
  0x8e   :  { %v111_v25 = vadd.f32 %v110_v21, %v60_v20 }
  0x90   :  { %v122_v28 = vmax.f32 %v111_v25, 0.0 }
  0x91   :  { %v144_v36 = vpop.permute.xlu1 %143  ;;  %v140_v39 = vpop.permute.xlu0 %139 }
  0x93   :  { %v113_v10 = vpop.f32.mrf.mxu3 }
  0x94   :  { %v114_v22 = vadd.f32 %v113_v10, %v65_v14 }
  0x96   :  { %v123_v26 = vmax.f32 %v114_v22, 0.0 }
  0x9a   :  { %v197_v45 = vpop.permute.xlu1 %196  ;;  %v205_v57 = vpop.permute.xlu0 %204 }
  0x9b   :  { %v116_v13 = vpop.f32.mrf.mxu3 }
  0x9c   :  { %v117_v18 = vadd.f32 %v116_v13, %v70_v15 }
  0x9e   :  { %v124_v24 = vmax.f32 %v117_v18, 0.0 }
  0xa3   :  { %v119_v17 = vpop.f32.mrf.mxu3  ;;  %v227_v5 = vpop.permute.xlu1 %226 }
  0xa4   :  { %v120_v19 = vadd.f32 %v119_v17, %v75_v11 }
  0xa6   :  { %v125_v23 = vmax.f32 %v120_v19, 0.0 }
  0xa8   :  { %170 = vmatpush.msra.mxu1 %v125_v23  ;;  %260 = vmatpush.msra.mxu2 %v125_v23 }
  0xaa   :  { %171 = vmatpush.msra.mxu1 %v124_v24  ;;  %261 = vmatpush.msra.mxu2 %v124_v24 }
  0xac   :  { %172 = vmatpush.msra.mxu1 %v123_v26  ;;  %262 = vmatpush.msra.mxu2 %v123_v26 }
  0xae   :  { %173 = vmatpush.msra.mxu1 %v122_v28  ;;  %263 = vmatpush.msra.mxu2 %v122_v28 }
  0xaf   :  { %255 = vmatmul.msk.f32.vlgmr.msra.gmra.mxu1 %vm77_vm0, %v126_v29  ;;  %257 = vmatmul.msk.f32.vlgmr.msra.gmra.mxu2 %vm77_vm0, %v128_v30 }
  0xb7   :  { %256 = vmatmul.msk.f32.gmra.mxu1 %vm77_vm0, %v127_v31  ;;  %258 = vmatmul.msk.f32.gmra.mxu2 %vm77_vm0, %v129_v32 }
 0x12c   :  { %v175_v35 = vpop.f32.mrf.mxu1 }
 0x12d   :  { %v176_v37 = vadd.f32 %v175_v35, %v132_v33 }
 0x12f   :  { %v187_v41 = vmax.f32 %v176_v37, 0.0 }
 0x131   :  { %v207_v46 = vmul.f32 %v193_v38, %v187_v41 }
 0x132   :  { %v181_v40 = vpop.f32.mrf.mxu2 }
 0x133   :  { %v182_v42 = vadd.f32 %v181_v40, %v140_v39  ;;  %v212_v53 = vsel %vm211_vm1, %v207_v46, 0.0 }
 0x134   :  { %v178_v43 = vpop.f32.mrf.mxu1 }
 0x135   :  { %v179_v44 = vadd.f32 %v178_v43, %v136_v34  ;;  %v189_v47 = vmax.f32 %v182_v42, 0.0 }
 0x137   :  { %v188_v48 = vmax.f32 %v179_v44, 0.0  ;;  %v209_v52 = vmul.f32 %v201_v50, %v189_v47 }
 0x139   :  { %v208_v49 = vmul.f32 %v197_v45, %v188_v48  ;;  %v215_v59 = vsel %vm211_vm1, %v209_v52, 0.0 }
 0x13a   :  { %v184_v51 = vpop.f32.mrf.mxu2 }
 0x13b   :  { %v213_v54 = vsel %vm211_vm1, %v208_v49, 0.0  ;;  %v185_v55 = vadd.f32 %v184_v51, %v144_v36 }
 0x13c   :  { %v214_v56 = vadd.f32 %v213_v54, %v212_v53 }
 0x13d   :  { %v190_v58 = vmax.f32 %v185_v55, 0.0 }
 0x13e   :  { %v216_v61 = vadd.f32 %v215_v59, %v214_v56 }
 0x13f   :  { %v210_v60 = vmul.f32 %v205_v57, %v190_v58 }
 0x141   :  { %v217_v62 = vsel %vm211_vm1, %v210_v60, 0.0 }
 0x142   :  { %v218_v63 = vadd.f32 %v217_v62, %v216_v61 }
 0x144   :  { %v219_v0 = vrot.slane %v218_v63, 4 }
 0x146   :  { %v220_v1 = vadd.f32 %v219_v0, %v218_v63 }
 0x148   :  { %v221_v2 = vrot.slane %v220_v1, 2 }
 0x14a   :  { %v222_v3 = vadd.f32 %v221_v2, %v220_v1 }
 0x14c   :  { %v223_v4 = vrot.slane %v222_v3, 1 }
 0x14e   :  { %v224_v6 = vadd.f32 %v223_v4, %v222_v3 }
 0x150   :  { %v229_v7 = vadd.f32 %v227_v5, %v224_v6 }
 0x152   :  { %231 = vst.msk [vmem:[#allocation7] sm:$0x1] %vm230_vm2, %v229_v7 }
 0x153   :  { %242 = dma.vmem_to_hbm [thread:$0]  %s238_s3, 16, %s240_s17, [#allocation4]  }
 0x154   :  { %359 = dma.done.wait [#allocation4], 16  }
 0x155   :  { %360 = vsyncadd [#allocation4], 4294967280 }
 0x156   :  { %247 = vsyncpa [#allocation3], 1 }
 0x157   :  { %248 = vsyncpa [#allocation6], 1 }
 0x158   :  { %249 = vsyncpa [#allocation4], 1 }

</bundles_post_ra>
